<compile_context>
chip_gen: v7x
topology: tpu7x:2x2x1
jax: 0.10.0
libtpu: 0.0.40
codegen_flags: <defaults>
</compile_context>

<pallas_src>
import jax
import jax.numpy as jnp
from jax.experimental import pallas as pl
from jax.experimental.pallas import tpu as pltpu

LANE = 128  # TPU vreg lane width


def _model_kernel(x_ref, m_ref, b_ref, o_ref):
    # x_ref: (TR, 16)   -- 8 batch rows of (2,) inputs packed per lane-dense row
    # m_ref: (16, 128)  -- block-diagonal weight (kron(I8, tile(W^T, 4)))
    # b_ref: (1, 128)   -- bias tiled into the same packed layout
    # o_ref: (TR, 128)  -- 8 batch rows of (16,) outputs packed per lane-dense row
    acc = jnp.dot(x_ref[...], m_ref[...], preferred_element_type=jnp.float32)
    o_ref[...] = (acc + b_ref[...]).astype(o_ref.dtype)


def model_forward(x, weight, bias, *, block_rows=1024):
    """x: (B, 2) f32; weight: (4, 2) f32; bias: (4,) f32 -> (B, 16) f32."""
    B, in_f = x.shape                 # in_f = 2
    out_f = weight.shape[0]           # 4
    feat = 4 * out_f                  # 16 = output features after stack/flatten/cat
    pack = LANE // feat               # 8 batch rows packed per 128-lane row

    # ---- host-side parameter prep (tiny: 8 weights + 4 biases) ----
    wt_tiled = jnp.tile(weight.T, (1, 4))                  # (2, 16): Linear + x4 tile
    m = jnp.kron(jnp.eye(pack, dtype=jnp.float32), wt_tiled)  # (16, 128) block-diag
    b_lane = jnp.tile(bias, 4 * pack).reshape(1, LANE)     # (1, 128)

    # ---- pad batch and repack into lane-dense layout (row-major, free in HBM) ----
    rows = pl.cdiv(B, pack)           # packed rows needed
    if rows <= block_rows:
        tr = rows                     # single block == full (padded) array
        rows_p = rows
    else:
        tr = block_rows               # multiple of 8 -> valid sublane block
        rows_p = pl.cdiv(rows, tr) * tr
    Bp = rows_p * pack

    x_p = jnp.zeros((Bp, in_f), x.dtype).at[:B].set(x)
    x16 = x_p.reshape(rows_p, pack * in_f)                 # (rows_p, 16)

    grid = (rows_p // tr,)
    out_packed = pl.pallas_call(
        _model_kernel,
        out_shape=jax.ShapeDtypeStruct((rows_p, LANE), jnp.float32),
        grid=grid,
        in_specs=[
            pl.BlockSpec((tr, pack * in_f), lambda i: (i, 0)),
            pl.BlockSpec((pack * in_f, LANE), lambda i: (0, 0)),  # resident weight
            pl.BlockSpec((1, LANE), lambda i: (0, 0)),            # resident bias
        ],
        out_specs=pl.BlockSpec((tr, LANE), lambda i: (i, 0)),
        compiler_params=pltpu.CompilerParams(
            dimension_semantics=("parallel",)),
    )(x16, m, b_lane)

    # Undo the lane-dense packing (row-major reshape) and drop batch padding.
    return out_packed.reshape(Bp, feat)[:B]


def reference_forward(x, weight, bias):
    y = x @ weight.T + bias
    y = jnp.stack((y, y), axis=1).reshape(y.shape[0], -1)   # flatten(1)
    return jnp.concatenate((y, y), axis=1)


if __name__ == "__main__":
    key = jax.random.PRNGKey(0)
    kx, kw, kb = jax.random.split(key, 3)

    # Input matching the PyTorch example: x = torch.randn(2, 2)
    x = jax.random.normal(kx, (2, 2), dtype=jnp.float32)

    # Deterministic Linear(2, 4) params (PyTorch-style uniform init bound 1/sqrt(in))
    bound = 1.0 / jnp.sqrt(2.0)
    weight = jax.random.uniform(kw, (4, 2), minval=-bound, maxval=bound,
                                dtype=jnp.float32)
    bias = jax.random.uniform(kb, (4,), minval=-bound, maxval=bound,
                              dtype=jnp.float32)

    out = model_forward(x, weight, bias)
    jax.block_until_ready(out)
    ref = reference_forward(x, weight, bias)
    assert out.shape == (2, 16), out.shape
    assert jnp.allclose(out, ref, atol=1e-5, rtol=1e-5)

    # Also exercise the multi-block pipelined path (padding + grid > 1) at small size.
    xb = jax.random.normal(kx, (2048, 2), dtype=jnp.float32)
    outb = model_forward(xb, weight, bias, block_rows=128)
    jax.block_until_ready(outb)
    refb = reference_forward(xb, weight, bias)
    assert outb.shape == (2048, 16), outb.shape
    assert jnp.allclose(outb, refb, atol=1e-5, rtol=1e-5)

    print("KERNEL_OK")
</pallas_src>

<mosaic_0001>
module attributes {stable_mosaic.version = 11 : i64} {
  func.func @_model_kernel(%arg0: i32, %arg1: memref<1x16xf32, #tpu.memory_space<vmem>>, %arg2: memref<16x128xf32, #tpu.memory_space<vmem>>, %arg3: memref<1x128xf32, #tpu.memory_space<vmem>>, %arg4: memref<1x128xf32, #tpu.memory_space<vmem>>) attributes {dimension_semantics = [#tpu.dimension_semantics<parallel>], iteration_bounds = array<i64: 1>, scalar_prefetch = 0 : i64, scratch_operands = 0 : i64, tpu.core_type = #tpu.core_type<tc>, window_params = [{transform_indices = @transform_0, window_bounds = array<i64: 1, 16>}, {pipeline_mode = #tpu.pipeline_mode<synchronous>, transform_indices = @transform_1, window_bounds = array<i64: 16, 128>}, {pipeline_mode = #tpu.pipeline_mode<synchronous>, transform_indices = @transform_2, window_bounds = array<i64: 1, 128>}, {transform_indices = @transform_3, window_bounds = array<i64: 1, 128>}]} {
    %c0 = arith.constant 0 : index
    %c0_0 = arith.constant 0 : index
    %0 = vector.load %arg1[%c0, %c0_0] : memref<1x16xf32, #tpu.memory_space<vmem>>, vector<1x16xf32>
    %c0_1 = arith.constant 0 : index
    %c0_2 = arith.constant 0 : index
    %1 = vector.load %arg2[%c0_1, %c0_2] : memref<16x128xf32, #tpu.memory_space<vmem>>, vector<16x128xf32>
    %cst = arith.constant dense<0.000000e+00> : vector<1x128xf32>
    %2 = tpu.matmul %0, %1, %cst {dimension_numbers = #tpu.dot_dimension_numbers<[1], [0], [0], [1], [0, 0, 1, 1], [], []>} : vector<1x16xf32>, vector<16x128xf32>, vector<1x128xf32> -> vector<1x128xf32>
    %c0_3 = arith.constant 0 : index
    %c0_4 = arith.constant 0 : index
    %3 = vector.load %arg3[%c0_3, %c0_4] : memref<1x128xf32, #tpu.memory_space<vmem>>, vector<1x128xf32>
    %4 = arith.addf %2, %3 : vector<1x128xf32>
    %c0_5 = arith.constant 0 : index
    %c0_6 = arith.constant 0 : index
    %5 = vector.load %arg4[%c0_5, %c0_6] : memref<1x128xf32, #tpu.memory_space<vmem>>, vector<1x128xf32>
    tpu.vector_store %arg4[%c0_5, %c0_6], %4 {strides = array<i32>} : memref<1x128xf32, #tpu.memory_space<vmem>>, vector<1x128xf32>,
    return
  }
  func.func @transform_0(%arg0: i32) -> (i32, i32) {
    %c0_i32 = arith.constant 0 : i32
    %c0_i32_0 = arith.constant 0 : i32
    return %arg0, %c0_i32 : i32, i32
  }
  func.func @transform_1(%arg0: i32) -> (i32, i32) {
    %c0_i32 = arith.constant 0 : i32
    %c0_i32_0 = arith.constant 0 : i32
    %c0_i32_1 = arith.constant 0 : i32
    return %c0_i32, %c0_i32_0 : i32, i32
  }
  func.func @transform_2(%arg0: i32) -> (i32, i32) {
    %c0_i32 = arith.constant 0 : i32
    %c0_i32_0 = arith.constant 0 : i32
    %c0_i32_1 = arith.constant 0 : i32
    return %c0_i32, %c0_i32_0 : i32, i32
  }
  func.func @transform_3(%arg0: i32) -> (i32, i32) {
    %c0_i32 = arith.constant 0 : i32
    %c0_i32_0 = arith.constant 0 : i32
    return %arg0, %c0_i32 : i32, i32
  }
}

</mosaic_0001>

<bundles_post_ra>
// kernel: tpu_custom_call.1
= control target key start
LH: loop header
LB: loop body
LE: loop exit
PB: predicated region body
PF: predicated region fallthrough
CT: control target
= control target key end

     0   :  { %8 = vsyncpa [#allocation3], 0  ;;  %s304_s0 = inlined_call_operand.hbm [shape: f32[1,16], index: 0, kind: input, shape index: {}]   ;;  %s305_s1 = inlined_call_operand.hbm [shape: f32[16,128], index: 1, kind: input, shape index: {}]   ;;  %s306_s2 = inlined_call_operand.vmem [shape: f32[1,128], index: 2, kind: input, shape index: {}]   ;;  %s307_s3 = inlined_call_operand.hbm [shape: f32[1,128], index: 3, kind: output, shape index: {}]  }
   0x1   :  { %9 = vsyncpa [#allocation6], 0 }
   0x2   :  { %10 = vsyncpa [#allocation4], 0  ;;  %s230_s12 = smov [#allocation2]   ;;  %s231_s14 = smov [#allocation5]  }
   0x3   :  { %s17_s13 = sshll.u32 %s230_s12, 4  ;;  %s26_s15 = sshll.u32 %s231_s14, 4  ;;  %s18_s13 = int_to_ptr.vmem [resolvable:$true] %s17_s13  ;;  %s258_s15 = int_to_ptr.vmem [resolvable:$true] %s26_s15 }
   0x4   :  { %s158_s18 = scalar_lea.hbm %s304_s0, 16 }
   0x5   :  { %p159_p0 = scmp.ne.s32.totalorder %s304_s0, %s158_s18  ;;  %p162_p1 = scmp.lt.u32.totalorder %s158_s18, %s304_s0 }
   0x7   :  { %p164_p2 = pnand %p162_p1, %p159_p0 }
   0x9   :  { %167 = shalt.err (!%p164_p2)
}
   0xa   :  { %s168_s23 = scalar_lea.vmem %s18_s13, 16  ;;  %s172_s24 = scalar_lea.vmem %s18_s13, 32 }
   0xb   :  { %p169_p3 = scmp.ne.s32.totalorder %s18_s13, %s168_s23  ;;  %p173_p4 = scmp.lt.s32.totalorder %s18_s13, %s18_s13 }
   0xc   :  { %p174_p5 = scmp.lt.s32.totalorder %s172_s24, %s168_s23 }
   0xe   :  { %p175_p6 = por %p174_p5, %p173_p4 }
  0x10   :  { %p176_p7 = pnand %p175_p6, %p169_p3 }
  0x12   :  { %179 = shalt.err (!%p176_p7)
}
  0x13   :  { %20 = dma.hbm_to_vmem [thread:$0]  %s304_s0, 16, %s18_s13, [#allocation3]  }
  0x14   :  { %s180_s29 = scalar_lea.hbm %s305_s1, 256 }
  0x15   :  { %p181_p8 = scmp.ne.s32.totalorder %s305_s1, %s180_s29  ;;  %p184_p9 = scmp.lt.u32.totalorder %s180_s29, %s305_s1 }
  0x17   :  { %p186_p10 = pnand %p184_p9, %p181_p8 }
  0x19   :  { %189 = shalt.err (!%p186_p10)
}
  0x1a   :  { %s190_s7 = scalar_lea.vmem %s258_s15, 256  ;;  %p195_p12 = scmp.lt.s32.totalorder %s258_s15, %s258_s15 }
  0x1b   :  { %p191_p11 = scmp.ne.s32.totalorder %s258_s15, %s190_s7  ;;  %p196_p13 = scmp.lt.s32.totalorder %s190_s7, %s190_s7 }
  0x1d   :  { %p197_p0 = por %p196_p13, %p195_p12 }
  0x1f   :  { %p198_p1 = pnand %p197_p0, %p191_p11 }
  0x21   :  { %201 = shalt.err (!%p198_p1)
}
  0x22   :  { %s232_s0 = smov 128   ;;  %s233_s8 = smov 8  }
  0x23   :  { %32 = dma.hbm_to_vmem [thread:$0]  %s305_s1, 256, %s258_s15, [#allocation6], %s232_s0, %s232_s0, %s233_s8  }
  0x24   :  { %224 = dma.done.wait [#allocation3], 16  }
  0x25   :  { %225 = vsyncadd [#allocation3], 4294967280 }
  0x26   :  { %226 = dma.done.wait [#allocation6], 256  }
  0x27   :  { %227 = vsyncadd [#allocation6], 4294967040  ;;  %v234_v0 = vmov 0.0|0.0   ;;  %vm235_vm0 = vmmov 0   ;;  %v236_v1 = vmov 0.0   ;;  %v42_v2 = vld [vmem:[#allocation5] sm:$0xff] }
  0x28   :  { %147 = vmatprep.subr.bf16.mxu0 %v234_v0  ;;  %144 = vmatprep.mubr.msk.f32.mxu0 %vm235_vm0, %v236_v1  ;;  %v43_v3 = vld [vmem:[#allocation5 + $0x8] sm:$0xff]  ;;  %v41_v5 = vld [vmem:[#allocation2] sm:$0x1]  ;;  %vm45_vm1 = vcmask 130048   ;;  %s237_s1 = smov [#allocation7]  }
  0x29   :  { %v148_v4 = vpack.c.bf16 %v43_v3, %v42_v2  ;;  %v44_v6 = vld [vmem:[%s306_s2] sm:$0x1]  ;;  %s126_s13 = sshll.u32 %s237_s1, 4  ;;  %s127_s13 = int_to_ptr.vmem [resolvable:$true] %s126_s13 }
  0x2a   :  { %s202_s14 = scalar_lea.vmem %s127_s13, 16  ;;  %s206_s15 = scalar_lea.vmem %s127_s13, 32 }
  0x2b   :  { %149 = vmatpush3.bf16.msra.mxu0 %v148_v4  ;;  %p203_p2 = scmp.ne.s32.totalorder %s127_s13, %s202_s14  ;;  %p207_p3 = scmp.lt.s32.totalorder %s127_s13, %s127_s13 }
  0x2c   :  { %p208_p4 = scmp.lt.s32.totalorder %s206_s15, %s202_s14 }
  0x2e   :  { %145 = vmatmul.mubr.msk.f32.vlgmr.msra.gmra.mrb[0].mxu0 %vm45_vm1, %v41_v5  ;;  %p209_p5 = por %p208_p4, %p207_p3 }
  0x30   :  { %p210_p6 = pnand %p209_p5, %p203_p2 }
 0x101   :  { %v115_v7 = vpop.f32.mrb[0].mxu0 }
 0x102   :  { %v116_v8 = vadd.f32 %v115_v7, %v44_v6  ;;  %v146_v9 = vpop.f32.mrb[1].mxu0 }
 0x104   :  { %119 = vst [vmem:[#allocation7] sm:$0x1] %v116_v8 }
 0x105   :  { %213 = shalt.err (!%p210_p6)
}
 0x106   :  { %s214_s18 = scalar_lea.hbm %s307_s3, 16 }
 0x107   :  { %p215_p7 = scmp.ne.s32.totalorder %s307_s3, %s214_s18  ;;  %p218_p8 = scmp.lt.u32.totalorder %s214_s18, %s307_s3 }
 0x109   :  { %p220_p9 = pnand %p218_p8, %p215_p7 }
 0x10b   :  { %223 = shalt.err (!%p220_p9)
}
 0x10c   :  { %129 = dma.vmem_to_hbm [thread:$0]  %s127_s13, 16, %s307_s3, [#allocation4]  }
 0x10d   :  { %228 = dma.done.wait [#allocation4], 16  }
 0x10e   :  { %229 = vsyncadd [#allocation4], 4294967280 }
 0x10f   :  { %133 = vsyncpa [#allocation3], 1 }
 0x110   :  { %134 = vsyncpa [#allocation6], 1 }
 0x111   :  { %135 = vsyncpa [#allocation4], 1 }

</bundles_post_ra>
